<compile_context>
chip_gen: v7x
topology: tpu7x:2x2x1
jax: 0.10.0
libtpu: 0.0.40
codegen_flags: <defaults>
</compile_context>

<pallas_src>
import jax
import jax.numpy as jnp
from jax.experimental import pallas as pl
from jax.experimental.pallas import tpu as pltpu


# ---------------------------------------------------------------------------
# Fused Pallas kernel (built as a closure over static shape ints)
# ---------------------------------------------------------------------------
def _make_kernel(bt, H, WC):
    def kernel(x_ref, w1_ref, b1_ref, w2_ref, b2_ref, o_ref, xpad, midpad):
        # x_ref / o_ref : (bt, H, W*C)   lane-dense activations
        # w*_ref        : (3, W*C, W*C)  banded conv weights (BN scale folded)
        # b*_ref        : (1, W*C)       folded BN bias, pre-tiled to lanes
        # xpad / midpad : (bt, H+2, W*C) VMEM scratch; only halo ROWS zeroed
        zrow = jnp.zeros((bt, 1, WC), xpad.dtype)
        xpad[:, 0:1, :] = zrow
        xpad[:, H + 1:H + 2, :] = zrow
        midpad[:, 0:1, :] = zrow.astype(midpad.dtype)
        midpad[:, H + 1:H + 2, :] = zrow.astype(midpad.dtype)

        x = x_ref[...]                               # (bt, H, WC)
        xpad[:, 1:H + 1, :] = x                      # full-lane unmasked store

        def conv3x3(pad_ref, w_ref):
            # Banded conv: one lane-dense matmul per kernel row dy.
            acc = jnp.zeros((bt * H, WC), jnp.float32)
            for dy in range(3):                      # static unroll
                lhs = pad_ref[:, dy:dy + H, :].reshape(bt * H, WC)
                acc = acc + jnp.dot(lhs, w_ref[dy],
                                    preferred_element_type=jnp.float32)
            return acc

        # conv1 + folded-BN1 + ReLU
        mid = jnp.maximum(conv3x3(xpad, w1_ref) + b1_ref[...], 0.0)
        midpad[:, 1:H + 1, :] = mid.reshape(bt, H, WC).astype(midpad.dtype)

        # conv2 + folded-BN2 + residual add + ReLU
        out = conv3x3(midpad, w2_ref) + b2_ref[...]
        out = out + x.reshape(bt * H, WC).astype(jnp.float32)
        o_ref[...] = jnp.maximum(out, 0.0).reshape(bt, H, WC).astype(o_ref.dtype)

    return kernel


# ---------------------------------------------------------------------------
# Host-side parameter preparation
# ---------------------------------------------------------------------------
def _fold_bn(gamma, beta, mean, var, eps=1e-5):
    scale = gamma / jnp.sqrt(var + eps)
    bias = beta - mean * scale
    return scale, bias


def _banded_weights(w_hwio, scale, W):
    """HWIO (3,3,Cin,Cout) conv weights -> (3, W*Cin, W*Cout) block-tridiagonal
    band matrices (one per kernel row dy).  Width zero-padding and the dx taps
    are folded into the band so the kernel's LHS is just the plain lane-dense
    activation row (no im2col, no column halo)."""
    w = w_hwio * scale[None, None, None, :]               # fold BN scale
    Cin, Cout = w_hwio.shape[2], w_hwio.shape[3]
    win = jnp.arange(W)
    wout = jnp.arange(W)
    dx = win[:, None] - wout[None, :] + 1                  # (W, W)
    valid = (dx >= 0) & (dx <= 2)
    dxc = jnp.clip(dx, 0, 2)
    blocks = jnp.where(valid[None, :, :, None, None], w[:, dxc], 0.0)
    # (dy, win, wout, Cin, Cout) -> (dy, win, Cin, wout, Cout) -> band
    return blocks.transpose(0, 1, 3, 2, 4).reshape(3, W * Cin, W * Cout)


# ---------------------------------------------------------------------------
# Wrapper: BasicBlock forward (NCHW in/out, like PyTorch)
# ---------------------------------------------------------------------------
def basic_block_forward(x_nchw, params, *, batch_tile=None):
    B, C, H, W = x_nchw.shape
    bt = batch_tile if batch_tile is not None else B       # one step at B=2
    assert B % bt == 0
    WC = W * C

    # NCHW -> NHWC -> lane-dense (B, H, W*C)
    x = jnp.transpose(x_nchw, (0, 2, 3, 1)).reshape(B, H, WC)

    s1, b1 = _fold_bn(params["bn1_gamma"], params["bn1_beta"],
                      params["bn1_mean"], params["bn1_var"])
    s2, b2 = _fold_bn(params["bn2_gamma"], params["bn2_beta"],
                      params["bn2_mean"], params["bn2_var"])

    w1b = _banded_weights(params["w1"], s1, W).astype(x.dtype)   # (3, WC, WC)
    w2b = _banded_weights(params["w2"], s2, W).astype(x.dtype)
    b1t = jnp.tile(b1, W).reshape(1, WC).astype(jnp.float32)
    b2t = jnp.tile(b2, W).reshape(1, WC).astype(jnp.float32)

    out = pl.pallas_call(
        _make_kernel(bt, H, WC),
        out_shape=jax.ShapeDtypeStruct((B, H, WC), x.dtype),
        grid_spec=pltpu.PrefetchScalarGridSpec(
            num_scalar_prefetch=0,
            grid=(B // bt,),
            in_specs=[
                pl.BlockSpec((bt, H, WC), lambda i: (i, 0, 0)),   # x
                pl.BlockSpec((3, WC, WC), lambda i: (0, 0, 0)),   # banded w1
                pl.BlockSpec((1, WC), lambda i: (0, 0)),          # bias 1
                pl.BlockSpec((3, WC, WC), lambda i: (0, 0, 0)),   # banded w2
                pl.BlockSpec((1, WC), lambda i: (0, 0)),          # bias 2
            ],
            out_specs=pl.BlockSpec((bt, H, WC), lambda i: (i, 0, 0)),
            scratch_shapes=[
                pltpu.VMEM((bt, H + 2, WC), x.dtype),   # height-padded x
                pltpu.VMEM((bt, H + 2, WC), x.dtype),   # height-padded conv1
            ],
        ),
        compiler_params=pltpu.CompilerParams(
            dimension_semantics=("parallel",)),
    )(x, w1b, b1t, w2b, b2t)

    return jnp.transpose(out.reshape(B, H, W, C), (0, 3, 1, 2))


# ---------------------------------------------------------------------------
# Pure-JAX reference (for correctness check)
# ---------------------------------------------------------------------------
def _ref_forward(x_nchw, params):
    x = jnp.transpose(x_nchw, (0, 2, 3, 1))

    def conv(inp, w):
        return jax.lax.conv_general_dilated(
            inp, w, window_strides=(1, 1), padding=((1, 1), (1, 1)),
            dimension_numbers=("NHWC", "HWIO", "NHWC"))

    s1, b1 = _fold_bn(params["bn1_gamma"], params["bn1_beta"],
                      params["bn1_mean"], params["bn1_var"])
    s2, b2 = _fold_bn(params["bn2_gamma"], params["bn2_beta"],
                      params["bn2_mean"], params["bn2_var"])
    out = jnp.maximum(conv(x, params["w1"]) * s1 + b1, 0.0)
    out = conv(out, params["w2"]) * s2 + b2 + x
    out = jnp.maximum(out, 0.0)
    return jnp.transpose(out, (0, 3, 1, 2))


# ---------------------------------------------------------------------------
if __name__ == "__main__":
    B, C, H, W = 2, 8, 16, 16          # inplanes = planes = 8, stride = 1
    key = jax.random.PRNGKey(0)
    ks = jax.random.split(key, 11)

    x = jax.random.normal(ks[0], (B, C, H, W), jnp.float32)

    params = {
        "w1": 0.1 * jax.random.normal(ks[1], (3, 3, C, C), jnp.float32),
        "w2": 0.1 * jax.random.normal(ks[2], (3, 3, C, C), jnp.float32),
        "bn1_gamma": 1.0 + 0.1 * jax.random.normal(ks[3], (C,), jnp.float32),
        "bn1_beta": 0.1 * jax.random.normal(ks[4], (C,), jnp.float32),
        "bn1_mean": 0.05 * jax.random.normal(ks[5], (C,), jnp.float32),
        "bn1_var": 1.0 + 0.1 * jax.random.uniform(ks[6], (C,), jnp.float32),
        "bn2_gamma": 1.0 + 0.1 * jax.random.normal(ks[7], (C,), jnp.float32),
        "bn2_beta": 0.1 * jax.random.normal(ks[8], (C,), jnp.float32),
        "bn2_mean": 0.05 * jax.random.normal(ks[9], (C,), jnp.float32),
        "bn2_var": 1.0 + 0.1 * jax.random.uniform(ks[10], (C,), jnp.float32),
    }

    out = jax.block_until_ready(basic_block_forward(x, params))
    ref = jax.block_until_ready(_ref_forward(x, params))

    assert out.shape == (B, C, H, W)
    assert jnp.max(jnp.abs(out - ref)) < 1e-4, "mismatch vs reference"
    print("KERNEL_OK")
</pallas_src>

<mosaic_0001>
module attributes {stable_mosaic.version = 11 : i64} {
  func.func @kernel(%arg0: i32, %arg1: memref<2x16x128xf32, #tpu.memory_space<vmem>>, %arg2: memref<3x128x128xf32, #tpu.memory_space<vmem>>, %arg3: memref<1x128xf32, #tpu.memory_space<vmem>>, %arg4: memref<3x128x128xf32, #tpu.memory_space<vmem>>, %arg5: memref<1x128xf32, #tpu.memory_space<vmem>>, %arg6: memref<2x16x128xf32, #tpu.memory_space<vmem>>, %arg7: memref<2x18x128xf32, #tpu.memory_space<vmem>>, %arg8: memref<2x18x128xf32, #tpu.memory_space<vmem>>) attributes {dimension_semantics = [#tpu.dimension_semantics<parallel>], iteration_bounds = array<i64: 1>, scalar_prefetch = 0 : i64, scratch_operands = 2 : i64, tpu.core_type = #tpu.core_type<tc>, window_params = [{transform_indices = @transform_0, window_bounds = array<i64: 2, 16, 128>}, {pipeline_mode = #tpu.pipeline_mode<synchronous>, transform_indices = @transform_1, window_bounds = array<i64: 3, 128, 128>}, {pipeline_mode = #tpu.pipeline_mode<synchronous>, transform_indices = @transform_2, window_bounds = array<i64: 1, 128>}, {pipeline_mode = #tpu.pipeline_mode<synchronous>, transform_indices = @transform_3, window_bounds = array<i64: 3, 128, 128>}, {pipeline_mode = #tpu.pipeline_mode<synchronous>, transform_indices = @transform_4, window_bounds = array<i64: 1, 128>}, {transform_indices = @transform_5, window_bounds = array<i64: 2, 16, 128>}]} {
    %cst = arith.constant 0.000000e+00 : f32
    %0 = vector.broadcast %cst : f32 to vector<2x1x128xf32>
    %c0 = arith.constant 0 : index
    %c0_0 = arith.constant 0 : index
    %c0_1 = arith.constant 0 : index
    %1 = vector.load %arg7[%c0, %c0_0, %c0_1] : memref<2x18x128xf32, #tpu.memory_space<vmem>>, vector<2x1x128xf32>
    tpu.vector_store %arg7[%c0, %c0_0, %c0_1], %0 {strides = array<i32>} : memref<2x18x128xf32, #tpu.memory_space<vmem>>, vector<2x1x128xf32>,
    %c0_2 = arith.constant 0 : index
    %c17 = arith.constant 17 : index
    %c0_3 = arith.constant 0 : index
    %2 = vector.load %arg7[%c0_2, %c17, %c0_3] : memref<2x18x128xf32, #tpu.memory_space<vmem>>, vector<2x1x128xf32>
    tpu.vector_store %arg7[%c0_2, %c17, %c0_3], %0 {strides = array<i32>} : memref<2x18x128xf32, #tpu.memory_space<vmem>>, vector<2x1x128xf32>,
    %c0_4 = arith.constant 0 : index
    %c0_5 = arith.constant 0 : index
    %c0_6 = arith.constant 0 : index
    %3 = vector.load %arg8[%c0_4, %c0_5, %c0_6] : memref<2x18x128xf32, #tpu.memory_space<vmem>>, vector<2x1x128xf32>
    tpu.vector_store %arg8[%c0_4, %c0_5, %c0_6], %0 {strides = array<i32>} : memref<2x18x128xf32, #tpu.memory_space<vmem>>, vector<2x1x128xf32>,
    %c0_7 = arith.constant 0 : index
    %c17_8 = arith.constant 17 : index
    %c0_9 = arith.constant 0 : index
    %4 = vector.load %arg8[%c0_7, %c17_8, %c0_9] : memref<2x18x128xf32, #tpu.memory_space<vmem>>, vector<2x1x128xf32>
    tpu.vector_store %arg8[%c0_7, %c17_8, %c0_9], %0 {strides = array<i32>} : memref<2x18x128xf32, #tpu.memory_space<vmem>>, vector<2x1x128xf32>,
    %c0_10 = arith.constant 0 : index
    %c0_11 = arith.constant 0 : index
    %c0_12 = arith.constant 0 : index
    %5 = vector.load %arg1[%c0_10, %c0_11, %c0_12] : memref<2x16x128xf32, #tpu.memory_space<vmem>>, vector<2x16x128xf32>
    %c0_13 = arith.constant 0 : index
    %c1 = arith.constant 1 : index
    %c0_14 = arith.constant 0 : index
    %6 = vector.load %arg7[%c0_13, %c1, %c0_14] : memref<2x18x128xf32, #tpu.memory_space<vmem>>, vector<2x16x128xf32>
    tpu.vector_store %arg7[%c0_13, %c1, %c0_14], %5 {strides = array<i32>} : memref<2x18x128xf32, #tpu.memory_space<vmem>>, vector<2x16x128xf32>,
    %cst_15 = arith.constant 0.000000e+00 : f32
    %7 = vector.broadcast %cst_15 : f32 to vector<32x128xf32>
    %c0_16 = arith.constant 0 : index
    %c0_17 = arith.constant 0 : index
    %c0_18 = arith.constant 0 : index
    %8 = vector.load %arg7[%c0_16, %c0_17, %c0_18] : memref<2x18x128xf32, #tpu.memory_space<vmem>>, vector<2x16x128xf32>
    %9 = vector.shape_cast %8 : vector<2x16x128xf32> to vector<32x128xf32>
    %c0_19 = arith.constant 0 : index
    %c0_20 = arith.constant 0 : index
    %c0_21 = arith.constant 0 : index
    %10 = vector.load %arg2[%c0_19, %c0_20, %c0_21] : memref<3x128x128xf32, #tpu.memory_space<vmem>>, vector<1x128x128xf32>
    %11 = vector.shape_cast %10 : vector<1x128x128xf32> to vector<128x128xf32>
    %cst_22 = arith.constant dense<0.000000e+00> : vector<32x128xf32>
    %12 = tpu.matmul %9, %11, %cst_22 {dimension_numbers = #tpu.dot_dimension_numbers<[1], [0], [0], [1], [0, 0, 1, 1], [], []>} : vector<32x128xf32>, vector<128x128xf32>, vector<32x128xf32> -> vector<32x128xf32>
    %13 = arith.addf %7, %12 : vector<32x128xf32>
    %c0_23 = arith.constant 0 : index
    %c1_24 = arith.constant 1 : index
    %c0_25 = arith.constant 0 : index
    %14 = vector.load %arg7[%c0_23, %c1_24, %c0_25] : memref<2x18x128xf32, #tpu.memory_space<vmem>>, vector<2x16x128xf32>
    %15 = vector.shape_cast %14 : vector<2x16x128xf32> to vector<32x128xf32>
    %c1_26 = arith.constant 1 : index
    %c0_27 = arith.constant 0 : index
    %c0_28 = arith.constant 0 : index
    %16 = vector.load %arg2[%c1_26, %c0_27, %c0_28] : memref<3x128x128xf32, #tpu.memory_space<vmem>>, vector<1x128x128xf32>
    %17 = vector.shape_cast %16 : vector<1x128x128xf32> to vector<128x128xf32>
    %cst_29 = arith.constant dense<0.000000e+00> : vector<32x128xf32>
    %18 = tpu.matmul %15, %17, %cst_29 {dimension_numbers = #tpu.dot_dimension_numbers<[1], [0], [0], [1], [0, 0, 1, 1], [], []>} : vector<32x128xf32>, vector<128x128xf32>, vector<32x128xf32> -> vector<32x128xf32>
    %19 = arith.addf %13, %18 : vector<32x128xf32>
    %c0_30 = arith.constant 0 : index
    %c2 = arith.constant 2 : index
    %c0_31 = arith.constant 0 : index
    %20 = vector.load %arg7[%c0_30, %c2, %c0_31] : memref<2x18x128xf32, #tpu.memory_space<vmem>>, vector<2x16x128xf32>
    %21 = vector.shape_cast %20 : vector<2x16x128xf32> to vector<32x128xf32>
    %c2_32 = arith.constant 2 : index
    %c0_33 = arith.constant 0 : index
    %c0_34 = arith.constant 0 : index
    %22 = vector.load %arg2[%c2_32, %c0_33, %c0_34] : memref<3x128x128xf32, #tpu.memory_space<vmem>>, vector<1x128x128xf32>
    %23 = vector.shape_cast %22 : vector<1x128x128xf32> to vector<128x128xf32>
    %cst_35 = arith.constant dense<0.000000e+00> : vector<32x128xf32>
    %24 = tpu.matmul %21, %23, %cst_35 {dimension_numbers = #tpu.dot_dimension_numbers<[1], [0], [0], [1], [0, 0, 1, 1], [], []>} : vector<32x128xf32>, vector<128x128xf32>, vector<32x128xf32> -> vector<32x128xf32>
    %25 = arith.addf %19, %24 : vector<32x128xf32>
    %c0_36 = arith.constant 0 : index
    %c0_37 = arith.constant 0 : index
    %26 = vector.load %arg3[%c0_36, %c0_37] : memref<1x128xf32, #tpu.memory_space<vmem>>, vector<1x128xf32>
    %27 = vector.broadcast %26 : vector<1x128xf32> to vector<32x128xf32>
    %28 = arith.addf %25, %27 : vector<32x128xf32>
    %cst_38 = arith.constant 0.000000e+00 : f32
    %29 = vector.broadcast %cst_38 : f32 to vector<32x128xf32>
    %30 = arith.maximumf %28, %29 : vector<32x128xf32>
    %31 = vector.shape_cast %30 : vector<32x128xf32> to vector<2x16x128xf32>
    %c0_39 = arith.constant 0 : index
    %c1_40 = arith.constant 1 : index
    %c0_41 = arith.constant 0 : index
    %32 = vector.load %arg8[%c0_39, %c1_40, %c0_41] : memref<2x18x128xf32, #tpu.memory_space<vmem>>, vector<2x16x128xf32>
    tpu.vector_store %arg8[%c0_39, %c1_40, %c0_41], %31 {strides = array<i32>} : memref<2x18x128xf32, #tpu.memory_space<vmem>>, vector<2x16x128xf32>,
    %cst_42 = arith.constant 0.000000e+00 : f32
    %33 = vector.broadcast %cst_42 : f32 to vector<32x128xf32>
    %c0_43 = arith.constant 0 : index
    %c0_44 = arith.constant 0 : index
    %c0_45 = arith.constant 0 : index
    %34 = vector.load %arg8[%c0_43, %c0_44, %c0_45] : memref<2x18x128xf32, #tpu.memory_space<vmem>>, vector<2x16x128xf32>
    %35 = vector.shape_cast %34 : vector<2x16x128xf32> to vector<32x128xf32>
    %c0_46 = arith.constant 0 : index
    %c0_47 = arith.constant 0 : index
    %c0_48 = arith.constant 0 : index
    %36 = vector.load %arg4[%c0_46, %c0_47, %c0_48] : memref<3x128x128xf32, #tpu.memory_space<vmem>>, vector<1x128x128xf32>
    %37 = vector.shape_cast %36 : vector<1x128x128xf32> to vector<128x128xf32>
    %cst_49 = arith.constant dense<0.000000e+00> : vector<32x128xf32>
    %38 = tpu.matmul %35, %37, %cst_49 {dimension_numbers = #tpu.dot_dimension_numbers<[1], [0], [0], [1], [0, 0, 1, 1], [], []>} : vector<32x128xf32>, vector<128x128xf32>, vector<32x128xf32> -> vector<32x128xf32>
    %39 = arith.addf %33, %38 : vector<32x128xf32>
    %c0_50 = arith.constant 0 : index
    %c1_51 = arith.constant 1 : index
    %c0_52 = arith.constant 0 : index
    %40 = vector.load %arg8[%c0_50, %c1_51, %c0_52] : memref<2x18x128xf32, #tpu.memory_space<vmem>>, vector<2x16x128xf32>
    %41 = vector.shape_cast %40 : vector<2x16x128xf32> to vector<32x128xf32>
    %c1_53 = arith.constant 1 : index
    %c0_54 = arith.constant 0 : index
    %c0_55 = arith.constant 0 : index
    %42 = vector.load %arg4[%c1_53, %c0_54, %c0_55] : memref<3x128x128xf32, #tpu.memory_space<vmem>>, vector<1x128x128xf32>
    %43 = vector.shape_cast %42 : vector<1x128x128xf32> to vector<128x128xf32>
    %cst_56 = arith.constant dense<0.000000e+00> : vector<32x128xf32>
    %44 = tpu.matmul %41, %43, %cst_56 {dimension_numbers = #tpu.dot_dimension_numbers<[1], [0], [0], [1], [0, 0, 1, 1], [], []>} : vector<32x128xf32>, vector<128x128xf32>, vector<32x128xf32> -> vector<32x128xf32>
    %45 = arith.addf %39, %44 : vector<32x128xf32>
    %c0_57 = arith.constant 0 : index
    %c2_58 = arith.constant 2 : index
    %c0_59 = arith.constant 0 : index
    %46 = vector.load %arg8[%c0_57, %c2_58, %c0_59] : memref<2x18x128xf32, #tpu.memory_space<vmem>>, vector<2x16x128xf32>
    %47 = vector.shape_cast %46 : vector<2x16x128xf32> to vector<32x128xf32>
    %c2_60 = arith.constant 2 : index
    %c0_61 = arith.constant 0 : index
    %c0_62 = arith.constant 0 : index
    %48 = vector.load %arg4[%c2_60, %c0_61, %c0_62] : memref<3x128x128xf32, #tpu.memory_space<vmem>>, vector<1x128x128xf32>
    %49 = vector.shape_cast %48 : vector<1x128x128xf32> to vector<128x128xf32>
    %cst_63 = arith.constant dense<0.000000e+00> : vector<32x128xf32>
    %50 = tpu.matmul %47, %49, %cst_63 {dimension_numbers = #tpu.dot_dimension_numbers<[1], [0], [0], [1], [0, 0, 1, 1], [], []>} : vector<32x128xf32>, vector<128x128xf32>, vector<32x128xf32> -> vector<32x128xf32>
    %51 = arith.addf %45, %50 : vector<32x128xf32>
    %c0_64 = arith.constant 0 : index
    %c0_65 = arith.constant 0 : index
    %52 = vector.load %arg5[%c0_64, %c0_65] : memref<1x128xf32, #tpu.memory_space<vmem>>, vector<1x128xf32>
    %53 = vector.broadcast %52 : vector<1x128xf32> to vector<32x128xf32>
    %54 = arith.addf %51, %53 : vector<32x128xf32>
    %55 = vector.shape_cast %5 : vector<2x16x128xf32> to vector<32x128xf32>
    %56 = arith.addf %54, %55 : vector<32x128xf32>
    %cst_66 = arith.constant 0.000000e+00 : f32
    %57 = vector.broadcast %cst_66 : f32 to vector<32x128xf32>
    %58 = arith.maximumf %56, %57 : vector<32x128xf32>
    %59 = vector.shape_cast %58 : vector<32x128xf32> to vector<2x16x128xf32>
    %c0_67 = arith.constant 0 : index
    %c0_68 = arith.constant 0 : index
    %c0_69 = arith.constant 0 : index
    %60 = vector.load %arg6[%c0_67, %c0_68, %c0_69] : memref<2x16x128xf32, #tpu.memory_space<vmem>>, vector<2x16x128xf32>
    tpu.vector_store %arg6[%c0_67, %c0_68, %c0_69], %59 {strides = array<i32>} : memref<2x16x128xf32, #tpu.memory_space<vmem>>, vector<2x16x128xf32>,
    return
  }
  func.func @transform_0(%arg0: i32) -> (i32, i32, i32) {
    %c0_i32 = arith.constant 0 : i32
    %c0_i32_0 = arith.constant 0 : i32
    %c0_i32_1 = arith.constant 0 : i32
    return %arg0, %c0_i32, %c0_i32_0 : i32, i32, i32
  }
  func.func @transform_1(%arg0: i32) -> (i32, i32, i32) {
    %c0_i32 = arith.constant 0 : i32
    %c0_i32_0 = arith.constant 0 : i32
    %c0_i32_1 = arith.constant 0 : i32
    %c0_i32_2 = arith.constant 0 : i32
    return %c0_i32, %c0_i32_0, %c0_i32_1 : i32, i32, i32
  }
  func.func @transform_2(%arg0: i32) -> (i32, i32) {
    %c0_i32 = arith.constant 0 : i32
    %c0_i32_0 = arith.constant 0 : i32
    %c0_i32_1 = arith.constant 0 : i32
    return %c0_i32, %c0_i32_0 : i32, i32
  }
  func.func @transform_3(%arg0: i32) -> (i32, i32, i32) {
    %c0_i32 = arith.constant 0 : i32
    %c0_i32_0 = arith.constant 0 : i32
    %c0_i32_1 = arith.constant 0 : i32
    %c0_i32_2 = arith.constant 0 : i32
    return %c0_i32, %c0_i32_0, %c0_i32_1 : i32, i32, i32
  }
  func.func @transform_4(%arg0: i32) -> (i32, i32) {
    %c0_i32 = arith.constant 0 : i32
    %c0_i32_0 = arith.constant 0 : i32
    %c0_i32_1 = arith.constant 0 : i32
    return %c0_i32, %c0_i32_0 : i32, i32
  }
  func.func @transform_5(%arg0: i32) -> (i32, i32, i32) {
    %c0_i32 = arith.constant 0 : i32
    %c0_i32_0 = arith.constant 0 : i32
    %c0_i32_1 = arith.constant 0 : i32
    return %arg0, %c0_i32, %c0_i32_0 : i32, i32, i32
  }
}

</mosaic_0001>

<bundles_post_ra>
// kernel: tpu_custom_call.1
= control target key start
LH: loop header
LB: loop body
LE: loop exit
PB: predicated region body
PF: predicated region fallthrough
CT: control target
= control target key end

     0   :  { %10 = vsyncpa [#allocation5], 0  ;;  %s1569_s0 = inlined_call_operand.hbm [shape: f32[2,16,128], index: 0, kind: input, shape index: {}]   ;;  %s1570_s1 = inlined_call_operand.hbm [shape: f32[3,128,128], index: 1, kind: input, shape index: {}]   ;;  %s1571_s2 = inlined_call_operand.vmem [shape: f32[1,128], index: 2, kind: input, shape index: {}]   ;;  %s1572_s3 = inlined_call_operand.hbm [shape: f32[3,128,128], index: 3, kind: input, shape index: {}]   ;;  %s1573_s4 = inlined_call_operand.vmem [shape: f32[1,128], index: 4, kind: input, shape index: {}]   ;;  %s1574_s5 = inlined_call_operand.hbm [shape: f32[2,16,128], index: 5, kind: output, shape index: {}]  }
   0x1   :  { %11 = vsyncpa [#allocation8], 0 }
   0x2   :  { %12 = vsyncpa [#allocation6], 0  ;;  %s1439_s18 = smov [#allocation7]   ;;  %s1440_s20 = smov [#allocation4]  }
   0x3   :  { %s30_s19 = sshll.u32 %s1439_s18, 4  ;;  %s18_s21 = sshll.u32 %s1440_s20, 4  ;;  %s31_s19 = int_to_ptr.vmem [resolvable:$true] %s30_s19  ;;  %s1476_s21 = int_to_ptr.vmem [resolvable:$true] %s18_s21 }
   0x4   :  { %s1345_s24 = scalar_lea.hbm %s1570_s1, 6144 }
   0x5   :  { %p1346_p0 = scmp.ne.s32.totalorder %s1570_s1, %s1345_s24  ;;  %p1349_p1 = scmp.lt.u32.totalorder %s1345_s24, %s1570_s1 }
   0x7   :  { %p1351_p2 = pnand %p1349_p1, %p1346_p0 }
   0x9   :  { %1354 = shalt.err (!%p1351_p2)
}
   0xa   :  { %s1355_s29 = scalar_lea.vmem %s31_s19, 6144  ;;  %p1360_p4 = scmp.lt.s32.totalorder %s31_s19, %s31_s19 }
   0xb   :  { %p1356_p3 = scmp.ne.s32.totalorder %s31_s19, %s1355_s29  ;;  %p1361_p5 = scmp.lt.s32.totalorder %s1355_s29, %s1355_s29 }
   0xd   :  { %p1362_p6 = por %p1361_p5, %p1360_p4 }
   0xf   :  { %p1363_p7 = pnand %p1362_p6, %p1356_p3 }
  0x11   :  { %1366 = shalt.err (!%p1363_p7)
}
  0x12   :  { %s1441_s30 = smov 128   ;;  %s1442_s6 = smov 8  }
  0x13   :  { %36 = dma.hbm_to_vmem [thread:$0]  %s1570_s1, 6144, %s31_s19, [#allocation8], %s1441_s30, %s1441_s30, %s1442_s6  }
  0x14   :  { %s1367_s11 = scalar_lea.hbm %s1569_s0, 512 }
  0x15   :  { %p1368_p8 = scmp.ne.s32.totalorder %s1569_s0, %s1367_s11  ;;  %p1371_p9 = scmp.lt.u32.totalorder %s1367_s11, %s1569_s0 }
  0x17   :  { %p1373_p10 = pnand %p1371_p9, %p1368_p8 }
  0x19   :  { %1376 = shalt.err (!%p1373_p10)
}
  0x1a   :  { %s1377_s16 = scalar_lea.vmem %s1476_s21, 512  ;;  %p1382_p12 = scmp.lt.s32.totalorder %s1476_s21, %s1476_s21 }
  0x1b   :  { %p1378_p11 = scmp.ne.s32.totalorder %s1476_s21, %s1377_s16  ;;  %p1383_p13 = scmp.lt.s32.totalorder %s1377_s16, %s1377_s16 }
  0x1d   :  { %p1384_p0 = por %p1383_p13, %p1382_p12 }
  0x1f   :  { %p1385_p1 = pnand %p1384_p0, %p1378_p11 }
  0x21   :  { %1388 = shalt.err (!%p1385_p1)
}
  0x22   :  { %24 = dma.hbm_to_vmem [thread:$0]  %s1569_s0, 512, %s1476_s21, [#allocation5], %s1441_s30, %s1441_s30, %s1442_s6  }
  0x23   :  { %s1443_s18 = smov [#allocation9]   ;;  %s1389_s23 = scalar_lea.hbm %s1572_s3, 6144 }
  0x24   :  { %s44_s19 = sshll.u32 %s1443_s18, 4  ;;  %p1390_p2 = scmp.ne.s32.totalorder %s1572_s3, %s1389_s23  ;;  %s45_s19 = int_to_ptr.vmem [resolvable:$true] %s44_s19 }
  0x25   :  { %p1393_p3 = scmp.lt.u32.totalorder %s1389_s23, %s1572_s3 }
  0x27   :  { %p1395_p4 = pnand %p1393_p3, %p1390_p2 }
  0x29   :  { %1398 = shalt.err (!%p1395_p4)
}
  0x2a   :  { %s1399_s28 = scalar_lea.vmem %s45_s19, 6144  ;;  %p1404_p6 = scmp.lt.s32.totalorder %s45_s19, %s45_s19 }
  0x2b   :  { %p1400_p5 = scmp.ne.s32.totalorder %s45_s19, %s1399_s28  ;;  %p1405_p7 = scmp.lt.s32.totalorder %s1399_s28, %s1399_s28 }
  0x2d   :  { %p1406_p8 = por %p1405_p7, %p1404_p6 }
  0x2f   :  { %p1407_p9 = pnand %p1406_p8, %p1400_p5 }
  0x31   :  { %1410 = shalt.err (!%p1407_p9)
}
  0x32   :  { %50 = dma.hbm_to_vmem [thread:$0]  %s1572_s3, 6144, %s45_s19, [#allocation8], %s1441_s30, %s1441_s30, %s1442_s6  }
  0x33   :  { %1433 = dma.done.wait [#allocation5], 512  }
  0x34   :  { %1434 = vsyncadd [#allocation5], 4294966784 }
  0x35   :  { %1435 = dma.done.wait [#allocation8], 12288  }
  0x36   :  { %1436 = vsyncadd [#allocation8], 4294955008  ;;  %v1444_v0 = vmov 0.0   ;;  %v103_v1 = vld [vmem:[#allocation7 + $0x80] sm:$0xff]  ;;  %v104_v2 = vld [vmem:[#allocation7 + $0x88] sm:$0xff]  ;;  %s1445_s8 = smov [#allocation10]  }
  0x37   :  { %62 = vst [vmem:[#allocation2] sm:$0x1] %v1444_v0  ;;  %63 = vst [vmem:[#allocation2 + $0x18] sm:$0x1] %v1444_v0  ;;  %v105_v3 = vld [vmem:[#allocation7 + $0x90] sm:$0xff]  ;;  %v1130_v4 = vpack.c.bf16 %v104_v2, %v103_v1  ;;  %v106_v5 = vld [vmem:[#allocation7 + $0x98] sm:$0xff] }
  0x38   :  { %64 = vst [vmem:[#allocation2 + $0x11] sm:$0x1] %v1444_v0  ;;  %65 = vst [vmem:[#allocation2 + $0x29] sm:$0x1] %v1444_v0  ;;  %v1134_v6 = vpack.c.bf16 %v106_v5, %v105_v3  ;;  %v107_v7 = vld [vmem:[#allocation7 + $0xa0] sm:$0xff]  ;;  %v108_v8 = vld [vmem:[#allocation7 + $0xa8] sm:$0xff] }
  0x39   :  { %66 = vst [vmem:[#allocation3] sm:$0x1] %v1444_v0  ;;  %67 = vst [vmem:[#allocation3 + $0x18] sm:$0x1] %v1444_v0  ;;  %1131 = vmatprep.subr.bf16.mxu0 %v1130_v4  ;;  %v1138_v9 = vpack.c.bf16 %v108_v8, %v107_v7  ;;  %v1528_v10 = vld [vmem:[#allocation4] sm:$0xff]  ;;  %v109_v11 = vld [vmem:[#allocation7 + $0xb0] sm:$0xff] }
  0x3a   :  { %68 = vst [vmem:[#allocation3 + $0x11] sm:$0x1] %v1444_v0  ;;  %69 = vst [vmem:[#allocation3 + $0x29] sm:$0x1] %v1444_v0  ;;  %1133 = vmatpush3.bf16.msra.mxu0 %v1130_v4  ;;  %v110_v12 = vld [vmem:[#allocation7 + $0xb8] sm:$0xff]  ;;  %934 = vmatprep.mubr.f32.mxu0 %v1528_v10  ;;  %v1532_v13 = vld [vmem:[#allocation4 + $0x8] sm:$0xff] }
  0x3b   :  { %1135 = vmatprep.subr.bf16.mxu0 %v1134_v6  ;;  %74 = vst [vmem:[#allocation2 + $0x1] sm:$0xff] %v1528_v10  ;;  %75 = vst [vmem:[#allocation2 + $0x9] sm:$0xff] %v1532_v13  ;;  %v1142_v14 = vpack.c.bf16 %v110_v12, %v109_v11  ;;  %v111_v15 = vld [vmem:[#allocation7 + $0xc0] sm:$0xff]  ;;  %v112_v16 = vld [vmem:[#allocation7 + $0xc8] sm:$0xff]  ;;  %s767_s9 = sshll.u32 %s1445_s8, 4  ;;  %s768_s9 = int_to_ptr.vmem [resolvable:$true] %s767_s9 }
  0x3c   :  { %v1535_v17 = vld [vmem:[#allocation4 + $0x10] sm:$0xff]  ;;  %v1538_v18 = vld [vmem:[#allocation4 + $0x18] sm:$0xff]  ;;  %v1146_v19 = vpack.c.bf16 %v112_v16, %v111_v15  ;;  %v115_v23 = vld [vmem:[#allocation7 + $0xe0] sm:$0xff]  ;;  %p1416_p11 = scmp.lt.s32.totalorder %s768_s9, %s768_s9 }
  0x3d   :  { %76 = vst [vmem:[#allocation2 + $0x19] sm:$0xff] %v1535_v17  ;;  %77 = vst [vmem:[#allocation2 + $0x21] sm:$0xff] %v1538_v18  ;;  %v113_v20 = vld [vmem:[#allocation7 + $0xd0] sm:$0xff]  ;;  %v114_v21 = vld [vmem:[#allocation7 + $0xd8] sm:$0xff] }
  0x3e   :  { %1137 = vmatpush3.bf16.msra.mxu0 %v1134_v6  ;;  %v1150_v22 = vpack.c.bf16 %v114_v21, %v113_v20  ;;  %v116_v24 = vld [vmem:[#allocation7 + $0xe8] sm:$0xff]  ;;  %v443_v25 = vld [vmem:[#allocation9 + $0x80] sm:$0xff]  ;;  %v445_v27 = vld [vmem:[#allocation9 + $0x90] sm:$0xff] }
  0x3f   :  { %1139 = vmatprep.subr.bf16.mxu0 %v1138_v9  ;;  %v444_v26 = vld [vmem:[#allocation9 + $0x88] sm:$0xff]  ;;  %v1154_v28 = vpack.c.bf16 %v116_v24, %v115_v23  ;;  %v117_v29 = vld [vmem:[#allocation7 + $0xf0] sm:$0xff]  ;;  %v446_v31 = vld [vmem:[#allocation9 + $0x98] sm:$0xff] }
  0x40   :  { %v1226_v30 = vpack.c.bf16 %v444_v26, %v443_v25  ;;  %v118_v32 = vld [vmem:[#allocation7 + $0xf8] sm:$0xff]  ;;  %v1230_v33 = vpack.c.bf16 %v446_v31, %v445_v27  ;;  %v447_v34 = vld [vmem:[#allocation9 + $0xa0] sm:$0xff]  ;;  %v448_v35 = vld [vmem:[#allocation9 + $0xa8] sm:$0xff] }
  0x41   :  { %v1158_v36 = vpack.c.bf16 %v118_v32, %v117_v29  ;;  %v82_v37 = vld [vmem:[#allocation7] sm:$0xff]  ;;  %v1234_v38 = vpack.c.bf16 %v448_v35, %v447_v34  ;;  %v83_v39 = vld [vmem:[#allocation7 + $0x8] sm:$0xff]  ;;  %v449_v40 = vld [vmem:[#allocation9 + $0xb0] sm:$0xff] }
  0x42   :  { %1141 = vmatpush3.bf16.msra.mxu0 %v1138_v9  ;;  %1227 = vmatprep.subr.bf16.mxu1 %v1226_v30  ;;  %v450_v41 = vld [vmem:[#allocation9 + $0xb8] sm:$0xff]  ;;  %v1162_v42 = vpack.c.bf16 %v83_v39, %v82_v37  ;;  %v84_v44 = vld [vmem:[#allocation7 + $0x10] sm:$0xff]  ;;  %v451_v46 = vld [vmem:[#allocation9 + $0xc0] sm:$0xff] }
  0x43   :  { %1143 = vmatprep.subr.bf16.mxu0 %v1142_v14  ;;  %1229 = vmatpush3.bf16.msra.mxu1 %v1226_v30  ;;  %v1238_v43 = vpack.c.bf16 %v450_v41, %v449_v40  ;;  %v85_v45 = vld [vmem:[#allocation7 + $0x18] sm:$0xff]  ;;  %v452_v47 = vld [vmem:[#allocation9 + $0xc8] sm:$0xff]  ;;  %v86_v49 = vld [vmem:[#allocation7 + $0x20] sm:$0xff] }
  0x44   :  { %1231 = vmatprep.subr.bf16.mxu1 %v1230_v33  ;;  %v1166_v48 = vpack.c.bf16 %v85_v45, %v84_v44  ;;  %v87_v50 = vld [vmem:[#allocation7 + $0x28] sm:$0xff]  ;;  %v1242_v51 = vpack.c.bf16 %v452_v47, %v451_v46  ;;  %v78_v53 = vld [vmem:[#allocation2] sm:$0xff]  ;;  %v88_v54 = vld [vmem:[#allocation7 + $0x30] sm:$0xff] }
  0x45   :  { %v1170_v52 = vpack.c.bf16 %v87_v50, %v86_v49  ;;  %v89_v55 = vld [vmem:[#allocation7 + $0x38] sm:$0xff]  ;;  %v90_v57 = vld [vmem:[#allocation7 + $0x40] sm:$0xff]  ;;  %v91_v58 = vld [vmem:[#allocation7 + $0x48] sm:$0xff] }
  0x46   :  { %1145 = vmatpush3.bf16.msra.mxu0 %v1142_v14  ;;  %v1174_v56 = vpack.c.bf16 %v89_v55, %v88_v54  ;;  %v1178_v59 = vpack.c.bf16 %v91_v58, %v90_v57  ;;  %v92_v60 = vld [vmem:[#allocation7 + $0x50] sm:$0xff]  ;;  %v93_v61 = vld [vmem:[#allocation7 + $0x58] sm:$0xff]  ;;  %v94_v63 = vld [vmem:[#allocation7 + $0x60] sm:$0xff] }
  0x47   :  { %1147 = vmatprep.subr.bf16.mxu0 %v1146_v19  ;;  %1233 = vmatpush3.bf16.msra.mxu1 %v1230_v33  ;;  %v1182_v62 = vpack.c.bf16 %v93_v61, %v92_v60  ;;  %v95_v0 = vld [vmem:[#allocation7 + $0x68] sm:$0xff]  ;;  %v96_v2 = vld [vmem:[#allocation7 + $0x70] sm:$0xff]  ;;  %v97_v3 = vld [vmem:[#allocation7 + $0x78] sm:$0xff] }
  0x48   :  { %1235 = vmatprep.subr.bf16.mxu1 %v1234_v38  ;;  %v1186_v1 = vpack.c.bf16 %v95_v0, %v94_v63  ;;  %v1190_v4 = vpack.c.bf16 %v97_v3, %v96_v2  ;;  %v294_v5 = vld [vmem:[#allocation7 + $0x100] sm:$0xff]  ;;  %v295_v6 = vld [vmem:[#allocation7 + $0x108] sm:$0xff]  ;;  %v296_v8 = vld [vmem:[#allocation7 + $0x110] sm:$0xff] }
  0x49   :  { %v1194_v7 = vpack.c.bf16 %v295_v6, %v294_v5  ;;  %v297_v9 = vld [vmem:[#allocation7 + $0x118] sm:$0xff]  ;;  %v79_v11 = vld [vmem:[#allocation2 + $0x8] sm:$0xff]  ;;  %v298_v15 = vld [vmem:[#allocation7 + $0x120] sm:$0xff] }
  0x4a   :  { %1149 = vmatpush3.bf16.msra.mxu0 %v1146_v19  ;;  %v1198_v12 = vpack.c.bf16 %v297_v9, %v296_v8  ;;  %v80_v14 = vld [vmem:[#allocation2 + $0x18] sm:$0xff]  ;;  %v299_v16 = vld [vmem:[#allocation7 + $0x128] sm:$0xff]  ;;  %v81_v19 = vld [vmem:[#allocation2 + $0x20] sm:$0xff] }
  0x4b   :  { %1151 = vmatprep.subr.bf16.mxu0 %v1150_v22  ;;  %1237 = vmatpush3.bf16.msra.mxu1 %v1234_v38  ;;  %v1202_v20 = vpack.c.bf16 %v299_v16, %v298_v15  ;;  %v289_v21 = vld [vmem:[#allocation2 + $0x2] sm:$0xff]  ;;  %v301_v23 = vld [vmem:[#allocation7 + $0x138] sm:$0xff]  ;;  %v308_v34 = vld [vmem:[#allocation7 + $0x170] sm:$0xff] }
  0x4c   :  { %1239 = vmatprep.subr.bf16.mxu1 %v1238_v43  ;;  %v302_v25 = vld [vmem:[#allocation7 + $0x140] sm:$0xff]  ;;  %v303_v26 = vld [vmem:[#allocation7 + $0x148] sm:$0xff]  ;;  %v305_v29 = vld [vmem:[#allocation7 + $0x158] sm:$0xff] }
  0x4d   :  { %v1210_v27 = vpack.c.bf16 %v303_v26, %v302_v25  ;;  %v306_v31 = vld [vmem:[#allocation7 + $0x160] sm:$0xff]  ;;  %v307_v32 = vld [vmem:[#allocation7 + $0x168] sm:$0xff]  ;;  %v309_v35 = vld [vmem:[#allocation7 + $0x178] sm:$0xff] }
  0x4e   :  { %1153 = vmatpush3.bf16.msra.mxu0 %v1150_v22  ;;  %v300_v22 = vld [vmem:[#allocation7 + $0x130] sm:$0xff]  ;;  %v1218_v33 = vpack.c.bf16 %v307_v32, %v306_v31  ;;  %v291_v38 = vld [vmem:[#allocation2 + $0x1a] sm:$0xff]  ;;  %v292_v39 = vld [vmem:[#allocation2 + $0x22] sm:$0xff] }
  0x4f   :  { %1155 = vmatprep.subr.bf16.mxu0 %v1154_v28  ;;  %1241 = vmatpush3.bf16.msra.mxu1 %v1238_v43  ;;  %v1206_v24 = vpack.c.bf16 %v301_v23, %v300_v22  ;;  %v290_v37 = vld [vmem:[#allocation2 + $0xa] sm:$0xff]  ;;  %v454_v41 = vld [vmem:[#allocation9 + $0xd8] sm:$0xff]  ;;  %v455_v43 = vld [vmem:[#allocation9 + $0xe0] sm:$0xff] }
  0x50   :  { %1243 = vmatprep.subr.bf16.mxu1 %v1242_v51  ;;  %v453_v40 = vld [vmem:[#allocation9 + $0xd0] sm:$0xff]  ;;  %v456_v44 = vld [vmem:[#allocation9 + $0xe8] sm:$0xff]  ;;  %v458_v47 = vld [vmem:[#allocation9 + $0xf8] sm:$0xff] }
  0x51   :  { %v1250_v45 = vpack.c.bf16 %v456_v44, %v455_v43  ;;  %v457_v46 = vld [vmem:[#allocation9 + $0xf0] sm:$0xff]  ;;  %v422_v49 = vld [vmem:[#allocation9] sm:$0xff]  ;;  %v423_v50 = vld [vmem:[#allocation9 + $0x8] sm:$0xff] }
  0x52   :  { %1157 = vmatpush3.bf16.msra.mxu0 %v1154_v28  ;;  %v304_v28 = vld [vmem:[#allocation7 + $0x150] sm:$0xff]  ;;  %v425_v58 = vld [vmem:[#allocation9 + $0x18] sm:$0xff]  ;;  %v426_v2 = vld [vmem:[#allocation9 + $0x20] sm:$0xff] }
  0x53   :  { %1159 = vmatprep.subr.bf16.mxu0 %v1158_v36  ;;  %1245 = vmatpush3.bf16.msra.mxu1 %v1242_v51  ;;  %v1214_v30 = vpack.c.bf16 %v305_v29, %v304_v28  ;;  %v1258_v51 = vpack.c.bf16 %v423_v50, %v422_v49  ;;  %v424_v57 = vld [vmem:[#allocation9 + $0x10] sm:$0xff]  ;;  %v427_v3 = vld [vmem:[#allocation9 + $0x28] sm:$0xff]  ;;  %v429_v8 = vld [vmem:[#allocation9 + $0x38] sm:$0xff] }
  0x54   :  { %v1262_v0 = vpack.c.bf16 %v425_v58, %v424_v57  ;;  %v1266_v6 = vpack.c.bf16 %v427_v3, %v426_v2  ;;  %v432_v16 = vld [vmem:[#allocation9 + $0x50] sm:$0xff]  ;;  %v435_v22 = vld [vmem:[#allocation9 + $0x68] sm:$0xff]  ;;  %v437_v25 = vld [vmem:[#allocation9 + $0x78] sm:$0xff] }
  0x55   :  { %v635_v28 = vld [vmem:[#allocation9 + $0x108] sm:$0xff]  ;;  %v637_v31 = vld [vmem:[#allocation9 + $0x118] sm:$0xff]  ;;  %v642_v43 = vld [vmem:[#allocation9 + $0x140] sm:$0xff] }
  0x56   :  { %1161 = vmatpush3.bf16.msra.mxu0 %v1158_v36  ;;  %v1222_v36 = vpack.c.bf16 %v309_v35, %v308_v34  ;;  %v638_v34 = vld [vmem:[#allocation9 + $0x120] sm:$0xff]  ;;  %v639_v35 = vld [vmem:[#allocation9 + $0x128] sm:$0xff] }
  0x57   :  { %1163 = vmatprep.subr.bf16.mxu0 %v1162_v42  ;;  %v643_v44 = vld [vmem:[#allocation9 + $0x148] sm:$0xff]  ;;  %v646_v49 = vld [vmem:[#allocation9 + $0x160] sm:$0xff] }
  0x58   :  { %v647_v50 = vld [vmem:[#allocation9 + $0x168] sm:$0xff]  ;;  %v781_v58 = vld [vmem:[%s1573_s4] ss:$0 sm:$0xff]  ;;  %s1411_s4 = scalar_lea.vmem %s768_s9, 512 }
  0x59   :  { %935 = vmatmul.mubr.f32.vlgmr.msra.gmra.mrb[0].mxu0 %v1532_v13  ;;  %p1412_p10 = scmp.ne.s32.totalorder %s768_s9, %s1411_s4  ;;  %p1417_p12 = scmp.lt.s32.totalorder %s1411_s4, %s1411_s4 }
  0x5a   :  { %1165 = vmatpush3.bf16.msra.mxu0 %v1162_v42  ;;  %937 = vmatprep.mubr.f32.mxu0 %v1535_v17  ;;  %v1246_v42 = vpack.c.bf16 %v454_v41, %v453_v40  ;;  %v641_v40 = vld [vmem:[#allocation9 + $0x138] sm:$0xff] }
  0x5b   :  { %1167 = vmatprep.subr.bf16.mxu0 %v1166_v48  ;;  %p1418_p13 = por %p1417_p12, %p1416_p11 }
  0x5c   :  { %1247 = vmatprep.subr.bf16.mxu1 %v1246_v42 }
  0x5d   :  { %938 = vmatmul.mubr.f32.gmra.mrb[2].mxu0 %v1538_v18  ;;  %1249 = vmatpush3.bf16.msra.mxu1 %v1246_v42  ;;  %p1419_p0 = pnand %p1418_p13, %p1412_p10 }
  0x5e   :  { %1169 = vmatpush3.bf16.msra.mxu0 %v1166_v48  ;;  %972 = vmatprep.mubr.f32.mxu0 %v78_v53  ;;  %v1254_v48 = vpack.c.bf16 %v458_v47, %v457_v46  ;;  %v644_v46 = vld [vmem:[#allocation9 + $0x150] sm:$0xff]  ;;  %v645_v47 = vld [vmem:[#allocation9 + $0x158] sm:$0xff] }
  0x5f   :  { %1171 = vmatprep.subr.bf16.mxu0 %v1170_v52  ;;  %1251 = vmatprep.subr.bf16.mxu1 %v1250_v45 }
  0x61   :  { %1253 = vmatpush3.bf16.msra.mxu1 %v1250_v45  ;;  %v1306_v45 = vpack.c.bf16 %v643_v44, %v642_v43 }
  0x62   :  { %1173 = vmatpush3.bf16.msra.mxu0 %v1170_v52  ;;  %1255 = vmatprep.subr.bf16.mxu1 %v1254_v48  ;;  %v780_v52 = vld [vmem:[%s1571_s2] ss:$0 sm:$0xff] }
  0x63   :  { %1175 = vmatprep.subr.bf16.mxu0 %v1174_v56 }
  0x65   :  { %1257 = vmatpush3.bf16.msra.mxu1 %v1254_v48  ;;  %v1310_v48 = vpack.c.bf16 %v645_v47, %v644_v46 }
  0x66   :  { %1177 = vmatpush3.bf16.msra.mxu0 %v1174_v56  ;;  %1259 = vmatprep.subr.bf16.mxu1 %v1258_v51 }
  0x67   :  { %1179 = vmatprep.subr.bf16.mxu0 %v1178_v59 }
  0x6a   :  { %1181 = vmatpush3.bf16.msra.mxu0 %v1178_v59 }
  0x6b   :  { %1183 = vmatprep.subr.bf16.mxu0 %v1182_v62 }
  0x6e   :  { %1185 = vmatpush3.bf16.msra.mxu0 %v1182_v62 }
  0x6f   :  { %1187 = vmatprep.subr.bf16.mxu0 %v1186_v1 }
  0x72   :  { %1189 = vmatpush3.bf16.msra.mxu0 %v1186_v1 }
  0x73   :  { %1191 = vmatprep.subr.bf16.mxu0 %v1190_v4 }
  0x76   :  { %1193 = vmatpush3.bf16.msra.mxu0 %v1190_v4 }
  0x77   :  { %1195 = vmatprep.subr.bf16.mxu0 %v1194_v7 }
  0x79   :  { %973 = vmatmul.mubr.f32.vlgmr.msra.gmra.mrb[0].mxu0 %v79_v11 }
  0x7a   :  { %1197 = vmatpush3.bf16.msra.mxu0 %v1194_v7  ;;  %975 = vmatprep.mubr.f32.mxu0 %v80_v14  ;;  %v428_v7 = vld [vmem:[#allocation9 + $0x30] sm:$0xff]  ;;  %v431_v14 = vld [vmem:[#allocation9 + $0x48] sm:$0xff] }
  0x7b   :  { %1199 = vmatprep.subr.bf16.mxu0 %v1198_v12  ;;  %v1270_v11 = vpack.c.bf16 %v429_v8, %v428_v7 }
  0x7d   :  { %976 = vmatmul.mubr.f32.gmra.mrb[2].mxu0 %v81_v19  ;;  %v433_v19 = vld [vmem:[#allocation9 + $0x58] sm:$0xff] }
  0x7e   :  { %1201 = vmatpush3.bf16.msra.mxu0 %v1198_v12  ;;  %1010 = vmatprep.mubr.f32.mxu0 %v289_v21  ;;  %v430_v12 = vld [vmem:[#allocation9 + $0x40] sm:$0xff] }
  0x7f   :  { %1203 = vmatprep.subr.bf16.mxu0 %v1202_v20  ;;  %v1274_v15 = vpack.c.bf16 %v431_v14, %v430_v12  ;;  %v434_v21 = vld [vmem:[#allocation9 + $0x60] sm:$0xff] }
  0x80   :  { %v1282_v23 = vpack.c.bf16 %v435_v22, %v434_v21 }
  0x82   :  { %1205 = vmatpush3.bf16.msra.mxu0 %v1202_v20  ;;  %v1278_v20 = vpack.c.bf16 %v433_v19, %v432_v16 }
  0x83   :  { %1207 = vmatprep.subr.bf16.mxu0 %v1206_v24 }
  0x86   :  { %1209 = vmatpush3.bf16.msra.mxu0 %v1206_v24  ;;  %v436_v24 = vld [vmem:[#allocation9 + $0x70] sm:$0xff] }
  0x87   :  { %1211 = vmatprep.subr.bf16.mxu0 %v1210_v27  ;;  %v1286_v26 = vpack.c.bf16 %v437_v25, %v436_v24 }
  0x8a   :  { %1213 = vmatpush3.bf16.msra.mxu0 %v1210_v27  ;;  %v634_v27 = vld [vmem:[#allocation9 + $0x100] sm:$0xff] }
  0x8b   :  { %1215 = vmatprep.subr.bf16.mxu0 %v1214_v30  ;;  %v1290_v29 = vpack.c.bf16 %v635_v28, %v634_v27 }
  0x8e   :  { %1217 = vmatpush3.bf16.msra.mxu0 %v1214_v30  ;;  %v636_v30 = vld [vmem:[#allocation9 + $0x110] sm:$0xff] }
  0x8f   :  { %1219 = vmatprep.subr.bf16.mxu0 %v1218_v33  ;;  %v1294_v32 = vpack.c.bf16 %v637_v31, %v636_v30 }
  0x92   :  { %1221 = vmatpush3.bf16.msra.mxu0 %v1218_v33 }
  0x93   :  { %1223 = vmatprep.subr.bf16.mxu0 %v1222_v36 }
  0x96   :  { %1225 = vmatpush3.bf16.msra.mxu0 %v1222_v36 }
  0x99   :  { %1011 = vmatmul.mubr.f32.vlgmr.msra.gmra.mrb[0].mxu0 %v290_v37  ;;  %v1298_v37 = vpack.c.bf16 %v639_v35, %v638_v34 }
  0x9a   :  { %1013 = vmatprep.mubr.f32.mxu0 %v291_v38 }
  0x9d   :  { %1014 = vmatmul.mubr.f32.gmra.mrb[2].mxu0 %v292_v39  ;;  %v640_v39 = vld [vmem:[#allocation9 + $0x130] sm:$0xff] }
  0x9e   :  { %v1302_v42 = vpack.c.bf16 %v641_v40, %v640_v39 }
 0x16c   :  { %v1012_v53 = vpop.f32.mrb[0].mxu0 }
 0x16d   :  { %v407_v54 = vadd.f32 %v1012_v53, %v780_v52  ;;  %v376_v55 = vpop.f32.mrb[1].mxu0  ;;  %v649_v53 = vld [vmem:[#allocation9 + $0x178] sm:$0xff] }
 0x16e   :  { %v406_v56 = vadd.f32 %v780_v52, %v376_v55 }
 0x16f   :  { %v411_v59 = vmax.f32 %v407_v54, 0.0 }
 0x170   :  { %v410_v60 = vmax.f32 %v406_v56, 0.0  ;;  %v1015_v61 = vpop.f32.mrb[2].mxu0 }
 0x171   :  { %415 = vst [vmem:[#allocation3 + $0x9] sm:$0xff] %v411_v59  ;;  %v409_v62 = vadd.f32 %v1015_v61, %v780_v52  ;;  %v386_v63 = vpop.f32.mrb[3].mxu0 }
 0x172   :  { %414 = vst [vmem:[#allocation3 + $0x1] sm:$0xff] %v410_v60  ;;  %v408_v1 = vadd.f32 %v780_v52, %v386_v63  ;;  %1048 = vmatprep.mubr.f32.mxu1 %v410_v60  ;;  %v648_v52 = vld [vmem:[#allocation9 + $0x170] sm:$0xff] }
 0x173   :  { %v413_v4 = vmax.f32 %v409_v62, 0.0  ;;  %1049 = vmatmul.mubr.f32.vlgmr.msra.gmra.mrb[0].mxu1 %v411_v59  ;;  %v1318_v54 = vpack.c.bf16 %v649_v53, %v648_v52 }
 0x174   :  { %v412_v5 = vmax.f32 %v408_v1, 0.0  ;;  %1261 = vmatpush3.bf16.msra.mxu1 %v1258_v51  ;;  %v1314_v51 = vpack.c.bf16 %v647_v50, %v646_v49 }
 0x175   :  { %417 = vst [vmem:[#allocation3 + $0x21] sm:$0xff] %v413_v4  ;;  %1263 = vmatprep.subr.bf16.mxu1 %v1262_v0 }
 0x176   :  { %416 = vst [vmem:[#allocation3 + $0x19] sm:$0xff] %v412_v5  ;;  %1051 = vmatprep.mubr.f32.mxu1 %v412_v5 }
 0x177   :  { %1052 = vmatmul.mubr.f32.gmra.mrb[2].mxu1 %v413_v4 }
 0x178   :  { %1265 = vmatpush3.bf16.msra.mxu1 %v1262_v0  ;;  %v630_v55 = vld [vmem:[#allocation3 + $0xa] sm:$0xff] }
 0x179   :  { %v418_v9 = vld [vmem:[#allocation3] sm:$0xff]  ;;  %1267 = vmatprep.subr.bf16.mxu1 %v1266_v6  ;;  %v419_v33 = vld [vmem:[#allocation3 + $0x8] sm:$0xff] }
 0x17a   :  { %1086 = vmatprep.mubr.f32.mxu1 %v418_v9  ;;  %v629_v41 = vld [vmem:[#allocation3 + $0x2] sm:$0xff] }
 0x17c   :  { %1269 = vmatpush3.bf16.msra.mxu1 %v1266_v6  ;;  %v632_v57 = vld [vmem:[#allocation3 + $0x22] sm:$0xff] }
 0x17d   :  { %1271 = vmatprep.subr.bf16.mxu1 %v1270_v11  ;;  %v420_v36 = vld [vmem:[#allocation3 + $0x18] sm:$0xff]  ;;  %v421_v38 = vld [vmem:[#allocation3 + $0x20] sm:$0xff] }
 0x17e   :  { %v631_v56 = vld [vmem:[#allocation3 + $0x1a] sm:$0xff] }
 0x180   :  { %1273 = vmatpush3.bf16.msra.mxu1 %v1270_v11 }
 0x181   :  { %1275 = vmatprep.subr.bf16.mxu1 %v1274_v15 }
 0x184   :  { %1277 = vmatpush3.bf16.msra.mxu1 %v1274_v15 }
 0x185   :  { %1279 = vmatprep.subr.bf16.mxu1 %v1278_v20 }
 0x188   :  { %1281 = vmatpush3.bf16.msra.mxu1 %v1278_v20 }
 0x189   :  { %1283 = vmatprep.subr.bf16.mxu1 %v1282_v23 }
 0x18c   :  { %1285 = vmatpush3.bf16.msra.mxu1 %v1282_v23 }
 0x18d   :  { %1287 = vmatprep.subr.bf16.mxu1 %v1286_v26 }
 0x190   :  { %1289 = vmatpush3.bf16.msra.mxu1 %v1286_v26 }
 0x191   :  { %1291 = vmatprep.subr.bf16.mxu1 %v1290_v29 }
 0x193   :  { %1087 = vmatmul.mubr.f32.vlgmr.msra.gmra.mrb[0].mxu1 %v419_v33 }
 0x194   :  { %1089 = vmatprep.mubr.f32.mxu1 %v420_v36  ;;  %1293 = vmatpush3.bf16.msra.mxu1 %v1290_v29 }
 0x195   :  { %1295 = vmatprep.subr.bf16.mxu1 %v1294_v32 }
 0x197   :  { %1090 = vmatmul.mubr.f32.gmra.mrb[2].mxu1 %v421_v38 }
 0x198   :  { %1297 = vmatpush3.bf16.msra.mxu1 %v1294_v32  ;;  %1124 = vmatprep.mubr.f32.mxu1 %v629_v41 }
 0x199   :  { %1299 = vmatprep.subr.bf16.mxu1 %v1298_v37 }
 0x19c   :  { %1301 = vmatpush3.bf16.msra.mxu1 %v1298_v37 }
 0x19d   :  { %1303 = vmatprep.subr.bf16.mxu1 %v1302_v42 }
 0x1a0   :  { %1305 = vmatpush3.bf16.msra.mxu1 %v1302_v42 }
 0x1a1   :  { %1307 = vmatprep.subr.bf16.mxu1 %v1306_v45 }
 0x1a4   :  { %1309 = vmatpush3.bf16.msra.mxu1 %v1306_v45 }
 0x1a5   :  { %1311 = vmatprep.subr.bf16.mxu1 %v1310_v48 }
 0x1a8   :  { %1313 = vmatpush3.bf16.msra.mxu1 %v1310_v48 }
 0x1a9   :  { %1315 = vmatprep.subr.bf16.mxu1 %v1314_v51 }
 0x1ac   :  { %1317 = vmatpush3.bf16.msra.mxu1 %v1314_v51 }
 0x1ad   :  { %1319 = vmatprep.subr.bf16.mxu1 %v1318_v54 }
 0x1b0   :  { %1321 = vmatpush3.bf16.msra.mxu1 %v1318_v54 }
 0x1b3   :  { %1125 = vmatmul.mubr.f32.vlgmr.msra.gmra.mrb[0].mxu1 %v630_v55 }
 0x1b4   :  { %1127 = vmatprep.mubr.f32.mxu1 %v631_v56 }
 0x1b7   :  { %1128 = vmatmul.mubr.f32.gmra.mrb[2].mxu1 %v632_v57 }
 0x286   :  { %v1126_v59 = vpop.f32.mrb[0].mxu1 }
 0x287   :  { %v747_v60 = vadd.f32 %v1126_v59, %v781_v58  ;;  %v716_v61 = vpop.f32.mrb[1].mxu1 }
 0x288   :  { %v746_v62 = vadd.f32 %v781_v58, %v716_v61 }
 0x289   :  { %v751_v63 = vadd.f32 %v747_v60, %v1532_v13 }
 0x28a   :  { %v750_v0 = vadd.f32 %v746_v62, %v1528_v10  ;;  %v1129_v1 = vpop.f32.mrb[2].mxu1 }
 0x28b   :  { %v755_v2 = vmax.f32 %v751_v63, 0.0  ;;  %v749_v3 = vadd.f32 %v1129_v1, %v781_v58  ;;  %v726_v4 = vpop.f32.mrb[3].mxu1 }
 0x28c   :  { %v754_v5 = vmax.f32 %v750_v0, 0.0  ;;  %v748_v6 = vadd.f32 %v781_v58, %v726_v4 }
 0x28d   :  { %759 = vst [vmem:[#allocation10 + $0x8] sm:$0xff] %v755_v2  ;;  %v753_v7 = vadd.f32 %v749_v3, %v1538_v18 }
 0x28e   :  { %758 = vst [vmem:[#allocation10] sm:$0xff] %v754_v5  ;;  %v752_v8 = vadd.f32 %v748_v6, %v1535_v17 }
 0x28f   :  { %v757_v9 = vmax.f32 %v753_v7, 0.0 }
 0x290   :  { %v756_v11 = vmax.f32 %v752_v8, 0.0 }
 0x291   :  { %761 = vst [vmem:[#allocation10 + $0x18] sm:$0xff] %v757_v9 }
 0x292   :  { %760 = vst [vmem:[#allocation10 + $0x10] sm:$0xff] %v756_v11 }
 0x293   :  { %1422 = shalt.err (!%p1419_p0)
}
 0x294   :  { %s1423_s12 = scalar_lea.hbm %s1574_s5, 512 }
 0x295   :  { %p1424_p1 = scmp.ne.s32.totalorder %s1574_s5, %s1423_s12  ;;  %p1427_p2 = scmp.lt.u32.totalorder %s1423_s12, %s1574_s5 }
 0x297   :  { %p1429_p3 = pnand %p1427_p2, %p1424_p1 }
 0x299   :  { %1432 = shalt.err (!%p1429_p3)
}
 0x29a   :  { %773 = dma.vmem_to_hbm [thread:$0]  %s768_s9, 512, %s1574_s5, [#allocation6], %s1441_s30, %s1441_s30, %s1442_s6  }
 0x29b   :  { %1437 = dma.done.wait [#allocation6], 512  }
 0x29c   :  { %1438 = vsyncadd [#allocation6], 4294966784 }
 0x29d   :  { %777 = vsyncpa [#allocation5], 1 }
 0x29e   :  { %778 = vsyncpa [#allocation8], 1 }
 0x29f   :  { %779 = vsyncpa [#allocation6], 1 }

</bundles_post_ra>
